<compile_context>
chip_gen: v7x
topology: tpu7x:2x2x1
jax: 0.10.0
libtpu: 0.0.40
codegen_flags: <defaults>
</compile_context>

<pallas_src>
import functools
import math

import jax
import jax.numpy as jnp
from jax import lax
from jax.experimental import pallas as pl
from jax.experimental.pallas import tpu as pltpu


def _flash_attn_kernel(q_ref, k_ref, v_ref, o_ref, m_scr, l_scr, acc_scr, *,
                       block_q, block_k, bf16_exp, approx_recip):
    """One grid point = (batch b, head h, query block qi, kv block ki).

    q_ref:   (block_q, d_k)   query tile, 1/sqrt(d_k) already folded in (compute dtype)
    k_ref:   (d_k, block_k)   key tile, pre-transposed
    v_ref:   (block_k, d_k)   value tile
    o_ref:   (block_q, d_k)   output tile (written only on the last kv step)
    m/l/acc: online-softmax running state (f32 VMEM scratch, persists across the kv axis)
    """
    qi = pl.program_id(2)
    ki = pl.program_id(3)

    @pl.when(ki == 0)
    def _init():
        m_scr[...] = jnp.full_like(m_scr, -jnp.inf)
        l_scr[...] = jnp.zeros_like(l_scr)
        acc_scr[...] = jnp.zeros_like(acc_scr)

    def update(masked):
        # (block_q, d_k) @ (d_k, block_k) -> f32 scores on the MXU.
        s = jnp.dot(q_ref[...], k_ref[...], preferred_element_type=jnp.float32)
        if masked:
            # Diagonal tile only; block_q == block_k so the local row/col compare is exact.
            row = lax.broadcasted_iota(jnp.int32, (block_q, block_k), 0)
            col = lax.broadcasted_iota(jnp.int32, (block_q, block_k), 1)
            s = jnp.where(col > row, jnp.float32(-jnp.inf), s)

        m_prev = m_scr[...]
        m_new = jnp.maximum(m_prev, jnp.max(s, axis=-1, keepdims=True))
        alpha = jnp.exp(m_prev - m_new)                              # (block_q, 1) f32
        if bf16_exp:
            # bf16 exp on the EUP (v6e/v7x); l/acc accumulation stays f32.
            p = jnp.exp((s - m_new).astype(jnp.bfloat16))
            p_sum = jnp.sum(p.astype(jnp.float32), axis=-1, keepdims=True)
        else:
            p = jnp.exp(s - m_new)
            p_sum = jnp.sum(p, axis=-1, keepdims=True)
        l_scr[...] = alpha * l_scr[...] + p_sum
        acc_scr[...] = alpha * acc_scr[...] + jnp.dot(
            p.astype(v_ref.dtype), v_ref[...], preferred_element_type=jnp.float32)
        m_scr[...] = m_new

    @pl.when(ki < qi)       # fully-visible KV tile: no mask
    def _off_diag():
        update(masked=False)

    @pl.when(ki == qi)      # diagonal tile: causal mask
    def _diag():
        update(masked=True)

    # ki > qi tiles: skipped entirely (their K/V DMAs are elided by the clamped index maps).

    @pl.when(ki == pl.num_programs(3) - 1)
    def _finalize():
        inv_l = pl.reciprocal(l_scr[...], approx=approx_recip)
        o_ref[...] = (acc_scr[...] * inv_l).astype(o_ref.dtype)


def mhsa_forward(x, w_qkv, w_o, num_heads, *, block_q=256,
                 compute_dtype=jnp.bfloat16, bf16_exp=None):
    """x: (B, S, D) f32; w_qkv: (3, H, d_k, D); w_o: (D, H*d_v). Returns (B, S, D) in x.dtype.

    v5e note: use block_q=128, compute_dtype=jnp.float32 (or bf16_exp=False) — its MXU is 128x128
    and it has no bf16 VPU/EUP path.
    """
    B, S, D = x.shape
    H = num_heads
    d_k = D // H
    block_q = min(block_q, S)
    block_k = block_q
    assert S % block_q == 0, "seq len must be divisible by block_q"
    # TODO(synk): pad/mask a ragged final query block for S % block_q != 0.

    cd = jnp.dtype(compute_dtype)
    if bf16_exp is None:
        bf16_exp = (cd == jnp.dtype(jnp.bfloat16))   # enable on the bf16 (v6e/v7x) path only
    approx_recip = (cd == jnp.dtype(jnp.bfloat16))

    hi = lax.Precision.HIGHEST
    scale = jnp.float32(1.0 / math.sqrt(d_k))
    x_c = x.astype(cd)
    wq = w_qkv[0].astype(cd)
    wk = w_qkv[1].astype(cd)
    wv = w_qkv[2].astype(cd)

    # Projections as single large XLA matmuls (f32 accumulation), computed ONCE per call.
    # q, v: (B, H, S, d_k); k pre-transposed: (B, H, d_k, S). Scale folded into q.
    q = jnp.einsum('bsm,hdm->bhsd', x_c, wq,
                   preferred_element_type=jnp.float32, precision=hi) * scale
    k = jnp.einsum('bsm,hdm->bhds', x_c, wk,
                   preferred_element_type=jnp.float32, precision=hi)
    v = jnp.einsum('bsm,hdm->bhsd', x_c, wv,
                   preferred_element_type=jnp.float32, precision=hi)
    q, k, v = q.astype(cd), k.astype(cd), v.astype(cd)

    nq = S // block_q
    nk = S // block_k

    kernel = functools.partial(
        _flash_attn_kernel, block_q=block_q, block_k=block_k,
        bf16_exp=bool(bf16_exp), approx_recip=bool(approx_recip))

    attn = pl.pallas_call(
        kernel,
        out_shape=jax.ShapeDtypeStruct((B, H, S, d_k), cd),
        grid_spec=pltpu.PrefetchScalarGridSpec(
            num_scalar_prefetch=0,
            grid=(B, H, nq, nk),
            in_specs=[
                pl.BlockSpec((None, None, block_q, d_k),
                             lambda b, h, qi, ki: (b, h, qi, 0)),
                # Clamp future (skipped) KV tiles to the diagonal block index: unchanged block
                # index between consecutive steps => no redundant DMA.
                pl.BlockSpec((None, None, d_k, block_k),
                             lambda b, h, qi, ki: (b, h, 0, lax.min(ki, qi))),
                pl.BlockSpec((None, None, block_k, d_k),
                             lambda b, h, qi, ki: (b, h, lax.min(ki, qi), 0)),
            ],
            out_specs=pl.BlockSpec((None, None, block_q, d_k),
                                   lambda b, h, qi, ki: (b, h, qi, 0)),
            scratch_shapes=[
                pltpu.VMEM((block_q, 1), jnp.float32),     # running max m
                pltpu.VMEM((block_q, 1), jnp.float32),     # running denom l
                pltpu.VMEM((block_q, d_k), jnp.float32),   # un-normalized output accumulator
            ],
        ),
        compiler_params=pltpu.CompilerParams(
            dimension_semantics=("parallel", "parallel", "parallel", "arbitrary")),
    )(q, k, v)

    # Concatenate heads (head-major, matching the PyTorch rearrange) and apply W_o as one
    # big XLA matmul.
    concat = jnp.transpose(attn, (0, 2, 1, 3)).reshape(B, S, D)
    out = jnp.einsum('bsk,dk->bsd', concat, w_o.astype(cd),
                     preferred_element_type=jnp.float32, precision=hi)
    return out.astype(x.dtype)


def mhsa_reference(x, w_qkv, w_o, num_heads):
    """Pure-JAX f32 reference mirroring the PyTorch forward (non-flash, explicit mask)."""
    B, S, D = x.shape
    d_k = D // num_heads
    hi = lax.Precision.HIGHEST
    qkv = jnp.einsum('bsm,qhdm->bqhsd', x, w_qkv, precision=hi)
    Q, K, V = qkv[:, 0], qkv[:, 1], qkv[:, 2]
    scores = jnp.einsum('bhqd,bhkd->bhqk', Q, K, precision=hi)
    mask = jnp.triu(jnp.ones((S, S), dtype=bool), 1)
    scores = jnp.where(mask, -jnp.inf, scores) / math.sqrt(d_k)
    w = jax.nn.softmax(scores, axis=-1)
    attn = jnp.einsum('bhqk,bhkd->bhqd', w, V, precision=hi)
    concat = jnp.transpose(attn, (0, 2, 1, 3)).reshape(B, S, D)
    return jnp.einsum('bsk,dk->bsd', concat, w_o, precision=hi)


if __name__ == "__main__":
    def run_case(B, S, d_model, num_heads, block_q):
        d_k = d_model // num_heads
        key = jax.random.PRNGKey(0)
        kx, kqkv, ko = jax.random.split(key, 3)

        x = jax.random.normal(kx, (B, S, d_model), dtype=jnp.float32)
        # Deterministic kaiming_uniform-like init (a=sqrt(5)) => U(-1/sqrt(fan_in), +)
        bound_qkv = 1.0 / math.sqrt(d_model)
        w_qkv = jax.random.uniform(kqkv, (3, num_heads, d_k, d_model),
                                   minval=-bound_qkv, maxval=bound_qkv, dtype=jnp.float32)
        bound_o = 1.0 / math.sqrt(num_heads * d_k)
        w_o = jax.random.uniform(ko, (d_model, num_heads * d_k),
                                 minval=-bound_o, maxval=bound_o, dtype=jnp.float32)

        ref = mhsa_reference(x, w_qkv, w_o, num_heads)

        # f32 compute path (v5e-style): must match the reference tightly.
        out_f32 = jax.block_until_ready(
            mhsa_forward(x, w_qkv, w_o, num_heads, block_q=block_q,
                         compute_dtype=jnp.float32, bf16_exp=False))
        assert out_f32.shape == ref.shape
        assert jnp.allclose(out_f32, ref, atol=2e-4, rtol=1e-3), \
            f"f32 kernel mismatch vs reference (S={S}, D={d_model})"

        # bf16 MXU-operand path with bf16 exp (v6e/v7x performance configuration).
        out_bf16 = jax.block_until_ready(
            mhsa_forward(x, w_qkv, w_o, num_heads, block_q=block_q,
                         compute_dtype=jnp.bfloat16))
        assert out_bf16.shape == ref.shape
        assert jnp.allclose(out_bf16, ref, atol=7e-2, rtol=7e-2), \
            f"bf16 kernel mismatch vs reference (S={S}, D={d_model})"

    # Small, module-consistent shapes (single query block: diagonal-tile / init / finalize path).
    run_case(B=2, S=8, d_model=32, num_heads=4, block_q=128)
    # Multi-block causal path: several q/kv blocks, d_k=64 — exercises the tiling, the causal
    # skip + DMA-elision of future KV tiles, and the online-softmax carry across kv steps.
    run_case(B=2, S=512, d_model=256, num_heads=4, block_q=128)

    print("KERNEL_OK")
</pallas_src>

<mosaic_0001>
module attributes {stable_mosaic.version = 11 : i64} {
  func.func @_flash_attn_kernel(%arg0: i32, %arg1: i32, %arg2: i32, %arg3: i32, %arg4: memref<1x1x8x8xf32, #tpu.memory_space<vmem>>, %arg5: memref<1x1x8x8xf32, #tpu.memory_space<vmem>>, %arg6: memref<1x1x8x8xf32, #tpu.memory_space<vmem>>, %arg7: memref<1x1x8x8xf32, #tpu.memory_space<vmem>>, %arg8: memref<8x1xf32, #tpu.memory_space<vmem>>, %arg9: memref<8x1xf32, #tpu.memory_space<vmem>>, %arg10: memref<8x8xf32, #tpu.memory_space<vmem>>) attributes {dimension_semantics = [#tpu.dimension_semantics<parallel>, #tpu.dimension_semantics<parallel>, #tpu.dimension_semantics<parallel>, #tpu.dimension_semantics<arbitrary>], iteration_bounds = array<i64: 2, 4, 1, 1>, scalar_prefetch = 0 : i64, scratch_operands = 3 : i64, tpu.core_type = #tpu.core_type<tc>, window_params = [{transform_indices = @transform_0, window_bounds = array<i64: 1, 1, 8, 8>}, {transform_indices = @transform_1, window_bounds = array<i64: 1, 1, 8, 8>}, {transform_indices = @transform_2, window_bounds = array<i64: 1, 1, 8, 8>}, {transform_indices = @transform_3, window_bounds = array<i64: 1, 1, 8, 8>}]} {
    %c0_i32 = arith.constant 0 : i32
    %0 = arith.cmpi eq, %arg3, %c0_i32 : i32
    %1 = arith.extui %0 : i1 to i32
    %c0_i32_0 = arith.constant 0 : i32
    %2 = arith.cmpi ne, %1, %c0_i32_0 : i32
    scf.if %2 {
      %cst = arith.constant 0xFF800000 : f32
      %12 = vector.broadcast %cst : f32 to vector<8x1xf32>
      %c0 = arith.constant 0 : index
      %c0_5 = arith.constant 0 : index
      %13 = vector.load %arg8[%c0, %c0_5] : memref<8x1xf32, #tpu.memory_space<vmem>>, vector<8x1xf32>
      tpu.vector_store %arg8[%c0, %c0_5], %12 {strides = array<i32>} : memref<8x1xf32, #tpu.memory_space<vmem>>, vector<8x1xf32>,
      %cst_6 = arith.constant 0.000000e+00 : f32
      %14 = vector.broadcast %cst_6 : f32 to vector<8x1xf32>
      %c0_7 = arith.constant 0 : index
      %c0_8 = arith.constant 0 : index
      %15 = vector.load %arg9[%c0_7, %c0_8] : memref<8x1xf32, #tpu.memory_space<vmem>>, vector<8x1xf32>
      tpu.vector_store %arg9[%c0_7, %c0_8], %14 {strides = array<i32>} : memref<8x1xf32, #tpu.memory_space<vmem>>, vector<8x1xf32>,
      %cst_9 = arith.constant 0.000000e+00 : f32
      %16 = vector.broadcast %cst_9 : f32 to vector<8x8xf32>
      %c0_10 = arith.constant 0 : index
      %c0_11 = arith.constant 0 : index
      %17 = vector.load %arg10[%c0_10, %c0_11] : memref<8x8xf32, #tpu.memory_space<vmem>>, vector<8x8xf32>
      tpu.vector_store %arg10[%c0_10, %c0_11], %16 {strides = array<i32>} : memref<8x8xf32, #tpu.memory_space<vmem>>, vector<8x8xf32>,
    } else {
    }
    %3 = arith.cmpi slt, %arg3, %arg2 : i32
    %4 = arith.extui %3 : i1 to i32
    %c0_i32_1 = arith.constant 0 : i32
    %5 = arith.cmpi ne, %4, %c0_i32_1 : i32
    scf.if %5 {
      %c0 = arith.constant 0 : index
      %c0_5 = arith.constant 0 : index
      %c0_6 = arith.constant 0 : index
      %c0_7 = arith.constant 0 : index
      %12 = vector.load %arg4[%c0, %c0_5, %c0_6, %c0_7] : memref<1x1x8x8xf32, #tpu.memory_space<vmem>>, vector<1x1x8x8xf32>
      %13 = vector.shape_cast %12 : vector<1x1x8x8xf32> to vector<8x8xf32>
      %c0_8 = arith.constant 0 : index
      %c0_9 = arith.constant 0 : index
      %c0_10 = arith.constant 0 : index
      %c0_11 = arith.constant 0 : index
      %14 = vector.load %arg5[%c0_8, %c0_9, %c0_10, %c0_11] : memref<1x1x8x8xf32, #tpu.memory_space<vmem>>, vector<1x1x8x8xf32>
      %15 = vector.shape_cast %14 : vector<1x1x8x8xf32> to vector<8x8xf32>
      %cst = arith.constant dense<0.000000e+00> : vector<8x8xf32>
      %16 = tpu.matmul %13, %15, %cst {dimension_numbers = #tpu.dot_dimension_numbers<[1], [0], [0], [1], [0, 0, 1, 1], [], []>} : vector<8x8xf32>, vector<8x8xf32>, vector<8x8xf32> -> vector<8x8xf32>
      %c0_12 = arith.constant 0 : index
      %c0_13 = arith.constant 0 : index
      %17 = vector.load %arg8[%c0_12, %c0_13] : memref<8x1xf32, #tpu.memory_space<vmem>>, vector<8x1xf32>
      %cst_14 = arith.constant dense<0xFF800000> : vector<8xf32>
      %18 = vector.multi_reduction <maximumf>, %16, %cst_14 [1] : vector<8x8xf32> to vector<8xf32>
      %19 = vector.shape_cast %18 : vector<8xf32> to vector<8x1xf32>
      %20 = arith.maximumf %17, %19 : vector<8x1xf32>
      %21 = arith.subf %17, %20 : vector<8x1xf32>
      %22 = math.exp %21 : vector<8x1xf32>
      %23 = vector.broadcast %20 : vector<8x1xf32> to vector<8x8xf32>
      %24 = arith.subf %16, %23 : vector<8x8xf32>
      %25 = math.exp %24 : vector<8x8xf32>
      %cst_15 = arith.constant dense<0.000000e+00> : vector<8xf32>
      %26 = vector.multi_reduction <add>, %25, %cst_15 [1] : vector<8x8xf32> to vector<8xf32>
      %27 = vector.shape_cast %26 : vector<8xf32> to vector<8x1xf32>
      %c0_16 = arith.constant 0 : index
      %c0_17 = arith.constant 0 : index
      %28 = vector.load %arg9[%c0_16, %c0_17] : memref<8x1xf32, #tpu.memory_space<vmem>>, vector<8x1xf32>
      %29 = arith.mulf %22, %28 : vector<8x1xf32>
      %30 = arith.addf %29, %27 : vector<8x1xf32>
      %c0_18 = arith.constant 0 : index
      %c0_19 = arith.constant 0 : index
      %31 = vector.load %arg9[%c0_18, %c0_19] : memref<8x1xf32, #tpu.memory_space<vmem>>, vector<8x1xf32>
      tpu.vector_store %arg9[%c0_18, %c0_19], %30 {strides = array<i32>} : memref<8x1xf32, #tpu.memory_space<vmem>>, vector<8x1xf32>,
      %c0_20 = arith.constant 0 : index
      %c0_21 = arith.constant 0 : index
      %32 = vector.load %arg10[%c0_20, %c0_21] : memref<8x8xf32, #tpu.memory_space<vmem>>, vector<8x8xf32>
      %33 = vector.broadcast %22 : vector<8x1xf32> to vector<8x8xf32>
      %34 = arith.mulf %33, %32 : vector<8x8xf32>
      %c0_22 = arith.constant 0 : index
      %c0_23 = arith.constant 0 : index
      %c0_24 = arith.constant 0 : index
      %c0_25 = arith.constant 0 : index
      %35 = vector.load %arg6[%c0_22, %c0_23, %c0_24, %c0_25] : memref<1x1x8x8xf32, #tpu.memory_space<vmem>>, vector<1x1x8x8xf32>
      %36 = vector.shape_cast %35 : vector<1x1x8x8xf32> to vector<8x8xf32>
      %cst_26 = arith.constant dense<0.000000e+00> : vector<8x8xf32>
      %37 = tpu.matmul %25, %36, %cst_26 {dimension_numbers = #tpu.dot_dimension_numbers<[1], [0], [0], [1], [0, 0, 1, 1], [], []>} : vector<8x8xf32>, vector<8x8xf32>, vector<8x8xf32> -> vector<8x8xf32>
      %38 = arith.addf %34, %37 : vector<8x8xf32>
      %c0_27 = arith.constant 0 : index
      %c0_28 = arith.constant 0 : index
      %39 = vector.load %arg10[%c0_27, %c0_28] : memref<8x8xf32, #tpu.memory_space<vmem>>, vector<8x8xf32>
      tpu.vector_store %arg10[%c0_27, %c0_28], %38 {strides = array<i32>} : memref<8x8xf32, #tpu.memory_space<vmem>>, vector<8x8xf32>,
      %c0_29 = arith.constant 0 : index
      %c0_30 = arith.constant 0 : index
      %40 = vector.load %arg8[%c0_29, %c0_30] : memref<8x1xf32, #tpu.memory_space<vmem>>, vector<8x1xf32>
      tpu.vector_store %arg8[%c0_29, %c0_30], %20 {strides = array<i32>} : memref<8x1xf32, #tpu.memory_space<vmem>>, vector<8x1xf32>,
    } else {
    }
    %6 = arith.cmpi eq, %arg3, %arg2 : i32
    %7 = arith.extui %6 : i1 to i32
    %c0_i32_2 = arith.constant 0 : i32
    %8 = arith.cmpi ne, %7, %c0_i32_2 : i32
    scf.if %8 {
      %c0 = arith.constant 0 : index
      %c0_5 = arith.constant 0 : index
      %c0_6 = arith.constant 0 : index
      %c0_7 = arith.constant 0 : index
      %12 = vector.load %arg4[%c0, %c0_5, %c0_6, %c0_7] : memref<1x1x8x8xf32, #tpu.memory_space<vmem>>, vector<1x1x8x8xf32>
      %13 = vector.shape_cast %12 : vector<1x1x8x8xf32> to vector<8x8xf32>
      %c0_8 = arith.constant 0 : index
      %c0_9 = arith.constant 0 : index
      %c0_10 = arith.constant 0 : index
      %c0_11 = arith.constant 0 : index
      %14 = vector.load %arg5[%c0_8, %c0_9, %c0_10, %c0_11] : memref<1x1x8x8xf32, #tpu.memory_space<vmem>>, vector<1x1x8x8xf32>
      %15 = vector.shape_cast %14 : vector<1x1x8x8xf32> to vector<8x8xf32>
      %cst = arith.constant dense<0.000000e+00> : vector<8x8xf32>
      %16 = tpu.matmul %13, %15, %cst {dimension_numbers = #tpu.dot_dimension_numbers<[1], [0], [0], [1], [0, 0, 1, 1], [], []>} : vector<8x8xf32>, vector<8x8xf32>, vector<8x8xf32> -> vector<8x8xf32>
      %17 = tpu.iota {dimensions = array<i32: 0>} : vector<8x8xi32>
      %18 = tpu.iota {dimensions = array<i32: 1>} : vector<8x8xi32>
      %19 = arith.cmpi sgt, %18, %17 : vector<8x8xi32>
      %cst_12 = arith.constant 0xFF800000 : f32
      %20 = vector.broadcast %cst_12 : f32 to vector<8x8xf32>
      %21 = arith.select %19, %20, %16 : vector<8x8xi1>, vector<8x8xf32>
      %c0_13 = arith.constant 0 : index
      %c0_14 = arith.constant 0 : index
      %22 = vector.load %arg8[%c0_13, %c0_14] : memref<8x1xf32, #tpu.memory_space<vmem>>, vector<8x1xf32>
      %cst_15 = arith.constant dense<0xFF800000> : vector<8xf32>
      %23 = vector.multi_reduction <maximumf>, %21, %cst_15 [1] : vector<8x8xf32> to vector<8xf32>
      %24 = vector.shape_cast %23 : vector<8xf32> to vector<8x1xf32>
      %25 = arith.maximumf %22, %24 : vector<8x1xf32>
      %26 = arith.subf %22, %25 : vector<8x1xf32>
      %27 = math.exp %26 : vector<8x1xf32>
      %28 = vector.broadcast %25 : vector<8x1xf32> to vector<8x8xf32>
      %29 = arith.subf %21, %28 : vector<8x8xf32>
      %30 = math.exp %29 : vector<8x8xf32>
      %cst_16 = arith.constant dense<0.000000e+00> : vector<8xf32>
      %31 = vector.multi_reduction <add>, %30, %cst_16 [1] : vector<8x8xf32> to vector<8xf32>
      %32 = vector.shape_cast %31 : vector<8xf32> to vector<8x1xf32>
      %c0_17 = arith.constant 0 : index
      %c0_18 = arith.constant 0 : index
      %33 = vector.load %arg9[%c0_17, %c0_18] : memref<8x1xf32, #tpu.memory_space<vmem>>, vector<8x1xf32>
      %34 = arith.mulf %27, %33 : vector<8x1xf32>
      %35 = arith.addf %34, %32 : vector<8x1xf32>
      %c0_19 = arith.constant 0 : index
      %c0_20 = arith.constant 0 : index
      %36 = vector.load %arg9[%c0_19, %c0_20] : memref<8x1xf32, #tpu.memory_space<vmem>>, vector<8x1xf32>
      tpu.vector_store %arg9[%c0_19, %c0_20], %35 {strides = array<i32>} : memref<8x1xf32, #tpu.memory_space<vmem>>, vector<8x1xf32>,
      %c0_21 = arith.constant 0 : index
      %c0_22 = arith.constant 0 : index
      %37 = vector.load %arg10[%c0_21, %c0_22] : memref<8x8xf32, #tpu.memory_space<vmem>>, vector<8x8xf32>
      %38 = vector.broadcast %27 : vector<8x1xf32> to vector<8x8xf32>
      %39 = arith.mulf %38, %37 : vector<8x8xf32>
      %c0_23 = arith.constant 0 : index
      %c0_24 = arith.constant 0 : index
      %c0_25 = arith.constant 0 : index
      %c0_26 = arith.constant 0 : index
      %40 = vector.load %arg6[%c0_23, %c0_24, %c0_25, %c0_26] : memref<1x1x8x8xf32, #tpu.memory_space<vmem>>, vector<1x1x8x8xf32>
      %41 = vector.shape_cast %40 : vector<1x1x8x8xf32> to vector<8x8xf32>
      %cst_27 = arith.constant dense<0.000000e+00> : vector<8x8xf32>
      %42 = tpu.matmul %30, %41, %cst_27 {dimension_numbers = #tpu.dot_dimension_numbers<[1], [0], [0], [1], [0, 0, 1, 1], [], []>} : vector<8x8xf32>, vector<8x8xf32>, vector<8x8xf32> -> vector<8x8xf32>
      %43 = arith.addf %39, %42 : vector<8x8xf32>
      %c0_28 = arith.constant 0 : index
      %c0_29 = arith.constant 0 : index
      %44 = vector.load %arg10[%c0_28, %c0_29] : memref<8x8xf32, #tpu.memory_space<vmem>>, vector<8x8xf32>
      tpu.vector_store %arg10[%c0_28, %c0_29], %43 {strides = array<i32>} : memref<8x8xf32, #tpu.memory_space<vmem>>, vector<8x8xf32>,
      %c0_30 = arith.constant 0 : index
      %c0_31 = arith.constant 0 : index
      %45 = vector.load %arg8[%c0_30, %c0_31] : memref<8x1xf32, #tpu.memory_space<vmem>>, vector<8x1xf32>
      tpu.vector_store %arg8[%c0_30, %c0_31], %25 {strides = array<i32>} : memref<8x1xf32, #tpu.memory_space<vmem>>, vector<8x1xf32>,
    } else {
    }
    %c0_i32_3 = arith.constant 0 : i32
    %9 = arith.cmpi eq, %arg3, %c0_i32_3 : i32
    %10 = arith.extui %9 : i1 to i32
    %c0_i32_4 = arith.constant 0 : i32
    %11 = arith.cmpi ne, %10, %c0_i32_4 : i32
    scf.if %11 {
      %c0 = arith.constant 0 : index
      %c0_5 = arith.constant 0 : index
      %12 = vector.load %arg9[%c0, %c0_5] : memref<8x1xf32, #tpu.memory_space<vmem>>, vector<8x1xf32>
      %13 = tpu.reciprocal %12 : vector<8x1xf32> -> vector<8x1xf32>
      %c0_6 = arith.constant 0 : index
      %c0_7 = arith.constant 0 : index
      %14 = vector.load %arg10[%c0_6, %c0_7] : memref<8x8xf32, #tpu.memory_space<vmem>>, vector<8x8xf32>
      %15 = vector.broadcast %13 : vector<8x1xf32> to vector<8x8xf32>
      %16 = arith.mulf %14, %15 : vector<8x8xf32>
      %c0_8 = arith.constant 0 : index
      %c0_9 = arith.constant 0 : index
      %c0_10 = arith.constant 0 : index
      %c0_11 = arith.constant 0 : index
      %17 = vector.load %arg7[%c0_8, %c0_9, %c0_10, %c0_11] : memref<1x1x8x8xf32, #tpu.memory_space<vmem>>, vector<1x1x8x8xf32>
      %18 = vector.shape_cast %17 : vector<1x1x8x8xf32> to vector<8x8xf32>
      %19 = vector.shape_cast %16 : vector<8x8xf32> to vector<1x1x8x8xf32>
      tpu.vector_store %arg7[%c0_8, %c0_9, %c0_10, %c0_11], %19 {strides = array<i32>} : memref<1x1x8x8xf32, #tpu.memory_space<vmem>>, vector<1x1x8x8xf32>,
    } else {
    }
    return
  }
  func.func @transform_0(%arg0: i32, %arg1: i32, %arg2: i32, %arg3: i32) -> (i32, i32, i32, i32) {
    %c0_i32 = arith.constant 0 : i32
    %c0_i32_0 = arith.constant 0 : i32
    return %arg0, %arg1, %arg2, %c0_i32 : i32, i32, i32, i32
  }
  func.func @transform_1(%arg0: i32, %arg1: i32, %arg2: i32, %arg3: i32) -> (i32, i32, i32, i32) {
    %0 = arith.minsi %arg3, %arg2 : i32
    %c0_i32 = arith.constant 0 : i32
    %c0_i32_0 = arith.constant 0 : i32
    return %arg0, %arg1, %c0_i32, %0 : i32, i32, i32, i32
  }
  func.func @transform_2(%arg0: i32, %arg1: i32, %arg2: i32, %arg3: i32) -> (i32, i32, i32, i32) {
    %0 = arith.minsi %arg3, %arg2 : i32
    %c0_i32 = arith.constant 0 : i32
    %c0_i32_0 = arith.constant 0 : i32
    return %arg0, %arg1, %0, %c0_i32 : i32, i32, i32, i32
  }
  func.func @transform_3(%arg0: i32, %arg1: i32, %arg2: i32, %arg3: i32) -> (i32, i32, i32, i32) {
    %c0_i32 = arith.constant 0 : i32
    %c0_i32_0 = arith.constant 0 : i32
    return %arg0, %arg1, %arg2, %c0_i32 : i32, i32, i32, i32
  }
}

</mosaic_0001>

<bundles_post_ra>
// kernel: tpu_custom_call.1
= control target key start
LH: loop header
LB: loop body
LE: loop exit
PB: predicated region body
PF: predicated region fallthrough
CT: control target
= control target key end

     0   :  { %s1548_s0 = inlined_call_operand.hbm [shape: f32[2,4,8,8], index: 0, kind: input, shape index: {}]   ;;  %s1549_s1 = inlined_call_operand.hbm [shape: f32[2,4,8,8], index: 1, kind: input, shape index: {}]   ;;  %s1550_s2 = inlined_call_operand.hbm [shape: f32[2,4,8,8], index: 2, kind: input, shape index: {}]   ;;  %s1551_s3 = inlined_call_operand.hbm [shape: f32[2,4,8,8], index: 3, kind: output, shape index: {}]  }
   0x1   :  { %1561 = sst [smem:[#allocation21_spill]] %s1549_s1 }
   0x2   :  { %8 = vsyncpa [#allocation6], 0 }
   0x3   :  { %10 = vsyncpa [#allocation6 + $0x1], 0 }
   0x4   :  { %11 = vsyncpa [#allocation9], 0 }
   0x5   :  { %13 = vsyncpa [#allocation9 + $0x1], 0 }
   0x6   :  { %14 = vsyncpa [#allocation7], 0 }
   0x7   :  { %16 = vsyncpa [#allocation7 + $0x1], 0  ;;  %s1251_s12 = smov 0   ;;  %s1253_s13 = smov 0  }
   0x8   :  { %s1255_s14 = smov 0   ;;  %s1257_s15 = smov 0  }
   0x9   :  { %s1259_s16 = smov 0   ;;  %s1261_s17 = smov 0  }
   0xa   :  { %s1263_s18 = smov 0   ;;  %s1265_s19 = smov 0  }
   0xb LB: > { %1562 = sst [smem:[#allocation15_spill]] %s1213_s17  ;;  %s1292_s20 = sadd.s32 4294967295, %s1221_s19   ;;  %s1221_s19 = sphi %s1265_s19, %s22_s19   ;;  %s1217_s18 = sphi %s1263_s18, %s1589_s18   ;;  %s1213_s17 = sphi %s1261_s17, %s1588_s17   ;;  %s1209_s16 = sphi %s1259_s16, %s1587_s16   ;;  %s1205_s15 = sphi %s1257_s15, %s1586_s15   ;;  %s1201_s14 = sphi %s1255_s14, %s1592_s14   ;;  %s1197_s13 = sphi %s1253_s13, %s1591_s13   ;;  %s1193_s12 = sphi %s1251_s12, %s1590_s12  }
   0xc   : > { %1563 = sst [smem:[#allocation16_spill]] %s1217_s18  ;;  %s889_s21 = sadd.s32 4294967294, %s1221_s19  }
   0xd   : > { %s44_s22 = sadd.s32 1, %s1213_s17  ;;  %s48_s23 = sadd.s32 1, %s1217_s18 }
   0xe   : > { %p46_p0 = scmp.ge.s32.totalorder %s44_s22, 4  ;;  %s59_s24 = sadd.s32 1, %s1201_s14 }
   0xf   : > { %p66_p1 = scmp.ne.s32.totalorder %s1201_s14, %s1197_s13  ;;  %p67_p2 = scmp.eq.s32.totalorder %s1221_s19, 0 }
  0x10   : > { %s1594_s22 = smov (%p46_p0, %s44_s22), 0  ;;  %s1596_s23 = smov (!%p46_p0, %s48_s23), %s1217_s18 }
  0x11   : > { %1564 = sst [smem:[#allocation17_spill]] %s1594_s22  ;;  %s53_s25 = ssub.s32 %s1213_s17, %s1594_s22 }
  0x12   : > { %p1306_p3 = por %p67_p2, %p66_p1  ;;  %p50_p4 = scmp.ge.s32.totalorder %s1596_s23, 2 }
  0x13   : > { %p72_p5 = scmp.ne.s32.totalorder %s1197_s13, %s1193_s12  ;;  %p73_p6 = scmp.eq.s32.totalorder %s1292_s20, 0 }
  0x14   : > { %p168_p7 = scmp.eq.s32.totalorder %s1292_s20, 7  ;;  %s1598_s23 = smov (%p50_p4, %s1596_s23), 0 }
  0x15   : > { %1566 = sst [smem:[#allocation18_spill]] %s1598_s23  ;;  %p1316_p8 = por %p73_p6, %p72_p5 }
  0x16   : > { %p1320_p9 = por %p168_p7, %p66_p1  ;;  %s52_s29 = ssub.s32 %s1217_s18, %s1598_s23 }
  0x17   : > { %s1567_s27 = scalar_select %p1316_p8, 1, 0 }
  0x18   : > { %s1568_s28 = scalar_select %p1320_p9, 1, 0 }
  0x19   : > { %p174_p10 = scmp.eq.s32.totalorder %s889_s21, 7  ;;  %s54_s30 = sor.u32 %s53_s25, %s52_s29 }
  0x1a   : > { %p57_p11 = scmp.eq.s32.totalorder %s54_s30, 0  ;;  %p951_p13 = scmp.lt.s32.totalorder %s1221_s19, 8 }
  0x1b   : > { %p1326_p12 = por %p174_p10, %p72_p5  ;;  %s1552_s5 = sand.u32 1, %s1201_s14  }
  0x1c   : > { %s1333_s6 = scalar_select %p57_p11, %s1201_s14, %s59_s24  }
  0x1d   : > { %s1569_s4 = scalar_select %p1326_p12, 1, 0 }
  0x1e   : > { %1571 = sst [smem:[#allocation20_spill]] %s1333_s6  ;;  %s1337_s7 = sshll.u32 %s1552_s5, 3 }
  0x1f   : > { %1570 = sst [smem:[#allocation19_spill]] %s1569_s4  ;;  %s893_s8 = sshll.u32 %s1217_s18, 2 }
  0x20   : > { %s204_s9 = sadd.s32 %s1213_s17, %s893_s8  ;;  %p1343_p0 = pnand %p951_p13, %p1306_p3 }
  0x21   : > { %s1347_s11 = sshll.u32 %s204_s9, 7  ;;  %s215_s21 = sand.u32 1, %s1221_s19  }
  0x22   : > { %s1572_s10 = scalar_select %p1343_p0, 1, 0 }
  0x23   : > { %s1573_s1 = sld [smem:[#allocation21_spill]]  ;;  %s219_s30 = scalar_lea.vmem [#allocation8], %s1337_s7 }
  0x24   : > { %s231_s26 = sshll.u32 %s219_s30, 4  ;;  %s1361_s8 = scalar_lea.sflag [#allocation9], %s215_s21  ;;  %s1358_s26 = int_to_ptr.vmem [resolvable:$true] %s231_s26 }
  0x25   : > { %p1367_p4 = pneg %p1343_p0 }
  0x29   : > { %s1354_s24 = scalar_lea.hbm %s1573_s1, %s1347_s11  ;;  %s1034_s30 = scalar_lea.hbm %s1573_s1, 1024 }
  0x2a   : > { %s1029_s9 = scalar_lea.hbm %s1354_s24, 128  ;;  %p1035_p7 = scmp.lt.u32.totalorder %s1354_s24, %s1573_s1 }
  0x2b   : > { %p1030_p3 = scmp.ne.s32.totalorder %s1354_s24, %s1029_s9  ;;  %p1036_p10 = scmp.lt.u32.totalorder %s1034_s30, %s1029_s9 }
  0x2c   : > { %p1038_p13 = scmp.lt.u32.totalorder %s1029_s9, %s1354_s24 }
  0x2d   : > { %p1032_p5 = pnand %p1367_p4, %p1030_p3  ;;  %p1037_p11 = por %p1036_p10, %p1035_p7 }
  0x2f   : > { %p1033_p6 = pneg %p1032_p5  ;;  %p1039_p1 = por %p1038_p13, %p1037_p11 }
  0x31   : > { %p1040_p2 = pnand %p1039_p1, %p1033_p6 }
  0x33   : > { %1043 = shalt.err (!%p1040_p2)
}
  0x34   : > { %s1044_s21 = scalar_lea.vmem %s1358_s26, 128  ;;  %s1223_s25 = smov [#allocation8]  }
  0x35   : > { %p1045_p3 = scmp.ne.s32.totalorder %s1358_s26, %s1044_s21  ;;  %s1049_s29 = sshll.u32 %s1223_s25, 4  ;;  %s1050_s29 = int_to_ptr.vmem [resolvable:$false] %s1049_s29 }
  0x36   : > { %s1051_s22 = scalar_lea.vmem %s1050_s29, 256  ;;  %p1052_p9 = scmp.lt.s32.totalorder %s1358_s26, %s1050_s29 }
  0x37   : > { %p1047_p5 = pnand %p1045_p3, %p1367_p4  ;;  %p1053_p8 = scmp.lt.s32.totalorder %s1051_s22, %s1044_s21 }
  0x39   : > { %p1048_p12 = pneg %p1047_p5  ;;  %p1054_p7 = por %p1053_p8, %p1052_p9 }
  0x3b   : > { %p1055_p10 = pnand %p1054_p7, %p1048_p12 }
  0x3d   : > { %1058 = shalt.err (!%p1055_p10)
}
  0x3e   : > { %943 = dma.hbm_to_vmem [thread:$0]  (!%p1343_p0), %s1354_s24, 128, %s1358_s26, %s1361_s8  }
  0x3f   : > { %p1575_p1 = scmp.lt.s32.totalorder %s1221_s19, 9  ;;  %p1576_p2 = scmp.ge.s32.totalorder %s1221_s19, 1 }
  0x40   : > { %s1403_s21 = scalar_lea.hbm %s1548_s0, %s1347_s11  ;;  %s198_s25 = scalar_lea.vmem [#allocation5], %s1337_s7 }
  0x41   : > { %p1395_p6 = pnand %p1576_p2, %p1575_p1  ;;  %s208_s29 = sshll.u32 %s198_s25, 4  ;;  %s1406_s29 = int_to_ptr.vmem [resolvable:$true] %s208_s29 }
  0x42   : > { %s1412_s22 = scalar_lea.hbm %s1550_s2, %s1347_s11  ;;  %s1578_s1 = sand.u32 1, %s1201_s14  }
  0x43   : > { %s1577_s23 = scalar_select %p1395_p6, 1, 0 }
  0x44   : > { %s195_s18 = scalar_lea.sflag [#allocation6], %s1578_s1  ;;  %s1059_s17 = scalar_lea.hbm %s1403_s21, 128 }
  0x45   : > { %p1060_p8 = scmp.ne.s32.totalorder %s1403_s21, %s1059_s17  ;;  %s1064_s6 = scalar_lea.hbm %s1548_s0, 1024 }
  0x46   : > { %p1065_p11 = scmp.lt.u32.totalorder %s1403_s21, %s1548_s0  ;;  %p1066_p13 = scmp.lt.u32.totalorder %s1064_s6, %s1059_s17 }
  0x47   : > { %p1062_p9 = pnand %p1060_p8, %p1367_p4  ;;  %p1068_p5 = scmp.lt.u32.totalorder %s1059_s17, %s1403_s21 }
  0x48   : > { %p1067_p3 = por %p1066_p13, %p1065_p11 }
  0x49   : > { %p1063_p12 = pneg %p1062_p9 }
  0x4a   : > { %p1069_p7 = por %p1068_p5, %p1067_p3 }
  0x4c   : > { %p1070_p10 = pnand %p1069_p7, %p1063_p12 }
  0x4e   : > { %1073 = shalt.err (!%p1070_p10)
}
  0x4f   : > { %s1074_s1 = scalar_lea.vmem %s1406_s29, 128  ;;  %s1224_s11 = smov [#allocation5]  }
  0x50   : > { %p1075_p1 = scmp.ne.s32.totalorder %s1406_s29, %s1074_s1  ;;  %s1079_s24 = sshll.u32 %s1224_s11, 4  ;;  %s1080_s24 = int_to_ptr.vmem [resolvable:$false] %s1079_s24 }
  0x51   : > { %s1081_s4 = scalar_lea.vmem %s1080_s24, 256  ;;  %p1082_p9 = scmp.lt.s32.totalorder %s1406_s29, %s1080_s24 }
  0x52   : > { %p1077_p2 = pnand %p1075_p1, %p1367_p4  ;;  %p1083_p6 = scmp.lt.s32.totalorder %s1081_s4, %s1074_s1 }
  0x54   : > { %p1078_p8 = pneg %p1077_p2  ;;  %p1084_p11 = por %p1083_p6, %p1082_p9 }
  0x56   : > { %p1085_p13 = pnand %p1084_p11, %p1078_p8 }
  0x58   : > { %1088 = shalt.err (!%p1085_p13)
}
  0x59   : > { %940 = dma.hbm_to_vmem [thread:$0]  (!%p1343_p0), %s1403_s21, 128, %s1406_s29, %s195_s18  }
  0x5a   : > { %s242_s17 = scalar_lea.vmem [#allocation10], %s1337_s7  ;;  %s1089_s26 = scalar_lea.hbm %s1412_s22, 128 }
  0x5b   : > { %s254_s6 = sshll.u32 %s242_s17, 4  ;;  %p1090_p12 = scmp.ne.s32.totalorder %s1412_s22, %s1089_s26  ;;  %s255_s6 = int_to_ptr.vmem [resolvable:$true] %s254_s6 }
  0x5c   : > { %s1094_s25 = scalar_lea.hbm %s1550_s2, 1024  ;;  %p1095_p5 = scmp.lt.u32.totalorder %s1412_s22, %s1550_s2 }
  0x5d   : > { %p1092_p6 = pnand %p1090_p12, %p1367_p4  ;;  %p1096_p7 = scmp.lt.u32.totalorder %s1094_s25, %s1089_s26 }
  0x5e   : > { %p1098_p1 = scmp.lt.u32.totalorder %s1089_s26, %s1412_s22 }
  0x5f   : > { %p1093_p3 = pneg %p1092_p6  ;;  %p1097_p10 = por %p1096_p7, %p1095_p5 }
  0x61   : > { %p1099_p2 = por %p1098_p1, %p1097_p10 }
  0x63   : > { %p1100_p8 = pnand %p1099_p2, %p1093_p3 }
  0x65   : > { %1103 = shalt.err (!%p1100_p8)
}
  0x66   : > { %s1104_s18 = scalar_lea.vmem %s255_s6, 128  ;;  %s1225_s7 = smov [#allocation10]  }
  0x67   : > { %p1105_p9 = scmp.ne.s32.totalorder %s255_s6, %s1104_s18  ;;  %s1109_s21 = sshll.u32 %s1225_s7, 4  ;;  %s1110_s21 = int_to_ptr.vmem [resolvable:$false] %s1109_s21 }
  0x68   : > { %s1111_s29 = scalar_lea.vmem %s1110_s21, 256  ;;  %p1112_p12 = scmp.lt.s32.totalorder %s255_s6, %s1110_s21 }
  0x69   : > { %p1107_p11 = pnand %p1105_p9, %p1367_p4  ;;  %p1113_p6 = scmp.lt.s32.totalorder %s1111_s29, %s1104_s18 }
  0x6b   : > { %p1108_p13 = pneg %p1107_p11  ;;  %p1114_p0 = por %p1113_p6, %p1112_p12 }
  0x6d   : > { %p1115_p5 = pnand %p1114_p0, %p1108_p13 }
  0x6f   : > { %1118 = shalt.err (!%p1115_p5)
}
  0x70   : > { %p1579_p7 = scmp.ne.s32.totalorder %s1572_s10, 0  ;;  %p1580_p3 = scmp.ne.s32.totalorder %s1577_s23, 0 }
  0x71   : > { %s1459_s5 = sand.u32 (!%p1580_p3), 1, %s1197_s13   ;;  %p1581_p0 = scmp.ne.s32.totalorder (!%p1580_p3), %s1567_s27, 0 }
  0x72   : > { %946 = dma.hbm_to_vmem [thread:$0]  (!%p1579_p7), %s1412_s22, 128, %s255_s6, %s1361_s8  }
  0x73   : > { %263 = sbr.rel (%p1580_p3) target bundleno = 939 (0x3ab), region = 32  ;;  %s1462_s24 = sshll.u32 (!%p1580_p3), %s1459_s5, 3 }
  0x74   : > { %s266_s4 = scalar_lea.sflag (!%p1580_p3), [#allocation6], %s1459_s5  ;;  %s269_s17 = scalar_lea.vmem (!%p1580_p3), [#allocation5], %s1462_s24 }
  0x7a   : > { %1180 = dma.done.wait (%p1581_p0), %s266_s4, 128  }
  0x7b   : > { %1182 = vsyncadd (%p1581_p0), %s266_s4, 4294967168  ;;  %s274_s10 = sand.u32 1, %s1292_s20   ;;  %s278_s23 = scalar_lea.vmem [#allocation8], %s1462_s24 }
  0x7c   : > { %s275_s8 = scalar_lea.sflag [#allocation9], %s274_s10 }
  0x7d   : > { %1184 = dma.done.wait (%p1581_p0), %s275_s8, 256  }
  0x7e   : > { %1186 = vsyncadd (%p1581_p0), %s275_s8, 4294967040  ;;  %vm331_vm0 = vcmask 64512   ;;  %v1226_v0 = vmov 0.0   ;;  %vm1227_vm1 = vmmov 0   ;;  %v526_v1 = vld [vmem:[%s278_s23] sm:$0xff]  ;;  %v525_v2 = vld [vmem:[%s269_s17] sm:$0xff]  ;;  %v601_v4 = vlaneseq }
  0x7f   : > { %919 = vmatprep.subr.mxu0 %v1226_v0  ;;  %921 = vmatprep.mubr.msk.f32.mxu0 %vm1227_vm1, %v1226_v0  ;;  %332 = vst.msk [vmem:[#allocation4] sm:$0xff] %vm331_vm0, %v1226_v0  ;;  %vm328_vm2 = vcmask 7168   ;;  %v1228_v3 = vmov -inf   ;;  %v1229_v11 = vmov 0   ;;  %s287_s20 = scalar_lea.vmem [#allocation10], %s1462_s24  ;;  %s911_s27 = sshll.u32 %s1209_s16, 2 }
  0x80   : > { %924 = vmatprep.subr.mxu1 %v1226_v0  ;;  %926 = vmatprep.mubr.msk.f32.mxu1 %vm1227_vm1, %v1226_v0  ;;  %329 = vst.msk [vmem:[#allocation2] sm:$0xff] %vm328_vm2, %v1228_v3  ;;  %330 = vst.msk [vmem:[#allocation3] sm:$0xff] %vm328_vm2, %v1226_v0  ;;  %v602_v5 = vshrl.u32 %v601_v4, 7  ;;  %v604_v6 = vand.u32 127, %v601_v4  ;;  %v638_v16 = vld [vmem:[%s287_s20] sm:$0xff]  ;;  %s742_s22 = sadd.s32 %s1205_s15, %s911_s27  ;;  %s319_s26 = scalar_lea.vmem [#allocation11], %s1462_s24 }
  0x81   : > { %920 = vmatpush3.msra.mxu0 %v526_v1  ;;  %1021 = vset.pattern.permute.xlu0 %v1229_v11  ;;  %s912_s6 = sshll.u32 %s742_s22, 7  ;;  %s746_s9 = sshll.u32 %s319_s26, 4  ;;  %s1495_s9 = int_to_ptr.vmem [resolvable:$true] %s746_s9 }
  0x82   : > { %922 = vmatmul.mubr.msk.f32.vlgmr.msra.gmra.mrb[0].mxu0 %vm331_vm0, %v525_v2  ;;  %vm605_vm3 = vcmp.gt.s32.totalorder %v604_v6, %v602_v5  ;;  %1022 = vset.pattern.permute.xlu1 %v1229_v11  ;;  %s1493_s1 = scalar_lea.hbm %s1551_s3, %s912_s6  ;;  %s730_s16 = scalar_lea.sflag [#allocation7], %s1459_s5 }
  0x83   : > { %925 = vmatpush3.msra.mxu1 %v638_v16  ;;  %s1119_s15 = scalar_lea.vmem %s1495_s9, 128  ;;  %p1582_p10 = scmp.ne.s32.totalorder %s1568_s28, 0 }
  0x84   : > { %p1120_p4 = scmp.ne.s32.totalorder %s1495_s9, %s1119_s15  ;;  %s1230_s11 = smov [#allocation11]  }
  0x85   : > { %s1123_s18 = sshll.u32 %s1230_s11, 4  ;;  %s1124_s18 = int_to_ptr.vmem [resolvable:$false] %s1123_s18 }
  0x86   : > { %v631_v30 = vld [vmem:[#allocation4] sm:$0xff]  ;;  %p1121_p1 = pnand %p1120_p4, %p1582_p10  ;;  %s1125_s7 = scalar_lea.vmem %s1124_s18, 256 }
  0x87   : > { %v607_v12 = vld [vmem:[#allocation2] sm:$0xff]  ;;  %v626_v24 = vld [vmem:[#allocation3] sm:$0xff]  ;;  %p1126_p8 = scmp.lt.s32.totalorder %s1495_s9, %s1124_s18  ;;  %p1127_p9 = scmp.lt.s32.totalorder %s1125_s7, %s1119_s15 }
  0x88   : > { %p1122_p2 = pneg %p1121_p1 }
  0x89   : > { %p1128_p11 = por %p1127_p9, %p1126_p8 }
  0x8b   : > { %p1129_p13 = pnand %p1128_p11, %p1122_p2 }
 0x155   : > { %v597_v7 = vpop.f32.mrb[0].mxu0 }
 0x156   : > { %v606_v8 = vsel %vm605_vm3, -inf, %v597_v7  ;;  %v923_v9 = vpop.f32.mrb[1].mxu0 }
 0x157   : > { %v608_v10 = vsel %vm331_vm0, %v606_v8, -inf }
 0x158   : > { %609 = vmax.xlane.f32.xlu0 %v608_v10 }
 0x1e5   : > { %v610_v13 = vpop.xlane.xlu0 %609 }
 0x1e6   : > { %v611_v14 = vmax.f32 %v607_v12, %v610_v13 }
 0x1e8   : > { %v612_v15 = vsub.f32 %v607_v12, %v611_v14  ;;  %714 = vst.msk [vmem:[#allocation2] sm:$0xff] %vm328_vm2, %v611_v14  ;;  %617 = vperm.xlu0 %1021, %v611_v14  }
 0x1ea   : > { %v613_v22 = vmul.f32 1.442695, %v612_v15 }
 0x267   : > { %v618_v17 = vpop.permute.xlu0 %617 }
 0x268   : > { %v620_v18 = vsub.f32 %v606_v8, %v618_v17 }
 0x26a   : > { %v621_v19 = vmul.f32 1.442695, %v620_v18 }
 0x26c   : > { %1023 = vpow2.f32 %v621_v19 }
 0x26d   : > { %1025 = vpow2.f32 %v613_v22 }
 0x276   : > { %v1024_v20 = vpop.eup %1023 }
 0x277   : > { %927 = vmatmul.mubr.msk.f32.vlgmr.msra.gmra.mrb[0].mxu1 %vm331_vm0, %v1024_v20  ;;  %v623_v21 = vsel %vm331_vm0, %v1024_v20, 0.0  ;;  %v1026_v23 = vpop.eup %1025 }
 0x278   : > { %624 = vadd.xlane.f32.xlu1 %v623_v21  ;;  %v627_v25 = vmul.f32 %v1026_v23, %v626_v24 }
 0x289   : > { %634 = vperm.xlu1 %1022, %v1026_v23  }
 0x305   : > { %v625_v26 = vpop.xlane.xlu1 %624 }
 0x306   : > { %v628_v27 = vadd.f32 %v627_v25, %v625_v26 }
 0x308   : > { %630 = vst.msk [vmem:[#allocation3] sm:$0xff] %vm328_vm2, %v628_v27 }
 0x309   : > { %v635_v31 = vpop.permute.xlu1 %634 }
 0x30a   : > { %v637_v32 = vmul.f32 %v635_v31, %v631_v30 }
 0x30f   : > { %v718_v28 = vld [vmem:[#allocation3] sm:$0xff] }
 0x310   : > { %1027 = vrcp.f32 %v718_v28 }
 0x31a   : > { %v1028_v29 = vpop.eup %1027 }
 0x31b   : > { %723 = vperm.xlu1 %1022, %v1028_v29  }
 0x34a   : > { %v708_v33 = vpop.f32.mrb[0].mxu1 }
 0x34b   : > { %v712_v34 = vadd.f32 %v708_v33, %v637_v32  ;;  %v928_v35 = vpop.f32.mrb[1].mxu1 }
 0x34d   : > { %713 = vst.msk [vmem:[#allocation4] sm:$0xff] %vm331_vm0, %v712_v34 }
 0x354   : > { %v720_v36 = vld [vmem:[#allocation4] sm:$0xff] }
 0x39a   : > { %v724_v37 = vpop.permute.xlu1 %723 }
 0x39b   : > { %v726_v38 = vmul.f32 %v724_v37, %v720_v36 }
 0x39d   : > { %728 = vst.msk [vmem:[%s319_s26] sm:$0xff] %vm331_vm0, %v726_v38 }
 0x39e   : > { %1132 = shalt.err (!%p1129_p13)
}
 0x39f   : > { %s1133_s21 = scalar_lea.hbm %s1493_s1, 128  ;;  %s1137_s24 = scalar_lea.hbm %s1551_s3, 1024 }
 0x3a0   : > { %p1134_p12 = scmp.ne.s32.totalorder %s1493_s1, %s1133_s21  ;;  %p1138_p7 = scmp.lt.u32.totalorder %s1493_s1, %s1551_s3 }
 0x3a1   : > { %p1139_p3 = scmp.lt.u32.totalorder %s1137_s24, %s1133_s21  ;;  %p1141_p4 = scmp.lt.u32.totalorder %s1133_s21, %s1493_s1 }
 0x3a2   : > { %p1135_p6 = pnand %p1134_p12, %p1582_p10 }
 0x3a3   : > { %p1140_p0 = por %p1139_p3, %p1138_p7 }
 0x3a4   : > { %p1136_p5 = pneg %p1135_p6 }
 0x3a5   : > { %p1142_p1 = por %p1141_p4, %p1140_p0 }
 0x3a7   : > { %p1143_p2 = pnand %p1142_p1, %p1136_p5 }
 0x3a9   : > { %1146 = shalt.err (!%p1143_p2)
}
 0x3aa   : > { %935 = dma.vmem_to_hbm [thread:$0]  (%p1582_p10), %s1495_s9, 128, %s1493_s1, %s730_s16  }
 0x3ab PF: > { %s1583_s10 = sld [smem:[#allocation19_spill]]  ;;  %p952_p8 = scmp.ge.s32.totalorder %s1221_s19, 2 }
 0x3ac   : > { %s758_s8 = sand.u32 1, %s1193_s12  }
 0x3ad   : > { %s759_s23 = scalar_lea.sflag [#allocation7], %s758_s8 }
 0x3b1   : > { %p1584_p9 = scmp.ne.s32.totalorder %s1583_s10, 0 }
 0x3b3   : > { %p948_p11 = pnand %p952_p8, %p1584_p9 }
 0x3b5   : > { %1188 = dma.done.wait (!%p948_p11), %s759_s23, 128  }
 0x3b6   : > { %1190 = vsyncadd (!%p948_p11), %s759_s23, 4294967168  ;;  %s22_s19 = sadd.s32 1, %s1221_s19   ;;  %s1585_s28 = sld [smem:[#allocation20_spill]] }
 0x3b7   : > { %p19_p13 = scmp.ge.s32.totalorder %s22_s19, 10   ;;  %s1586_s15 = sld [smem:[#allocation15_spill]] }
 0x3b8   : > { %s1587_s16 = sld [smem:[#allocation16_spill]]  ;;  %s1588_s17 = sld [smem:[#allocation17_spill]] }
 0x3b9   : > { %s1589_s18 = sld [smem:[#allocation18_spill]]  ;;  %s1590_s12 = smov %s1197_s13 }
 0x3ba   : > { %s1591_s13 = smov %s1201_s14  ;;  %21 = sbr.rel (!%p19_p13) target bundleno = 11 (0xb), region = 117 }
 0x3bc   : > { %s1592_s14 = smov %s1585_s28 }
 0x3c1   :  { %764 = vsyncpa [#allocation6], 1 }
 0x3c2   :  { %766 = vsyncpa [#allocation6 + $0x1], 1 }
 0x3c3   :  { %767 = vsyncpa [#allocation9], 1 }
 0x3c4   :  { %769 = vsyncpa [#allocation9 + $0x1], 1 }
 0x3c5   :  { %770 = vsyncpa [#allocation7], 1 }
 0x3c6   :  { %772 = vsyncpa [#allocation7 + $0x1], 1 }

</bundles_post_ra>
